<compile_context>
chip_gen: v6e
topology: v6e:2x2x1
jax: 0.10.0
libtpu: 0.0.40
codegen_flags: <defaults>
</compile_context>

<pallas_src>
import functools

import jax
import jax.numpy as jnp
from jax.experimental import pallas as pl
from jax.experimental.pallas import tpu as pltpu

_LANE = 128
_SUBLANE = 8


def _round_up(n, m):
    return ((n + m - 1) // m) * m


def _cdiv(a, b):
    return (a + b - 1) // b


def _mlp_kernel(x_ref, w1_ref, b1_ref, w2_ref, b2_ref, out_ref):
    # Layer 1: (TB, D_in) @ (D_in, 2Hp) -> f32 accumulator on the MXU.
    h = jnp.dot(x_ref[...], w1_ref[...], preferred_element_type=jnp.float32)
    h = h + b1_ref[...].astype(jnp.float32)
    h = jnp.maximum(h, 0.0)                       # ReLU
    # Dropout: identity (eval mode).

    # Layer 2: (TB, 2Hp) @ (2Hp, Dop) -> f32 accumulator.  Cast activations to
    # the weight dtype so bf16 weights hit the bf16 MXU path (no-op for f32).
    y = jnp.dot(h.astype(w2_ref.dtype), w2_ref[...],
                preferred_element_type=jnp.float32)
    y = y + b2_ref[...].astype(jnp.float32)

    # Sigmoid via one EUP transcendental: sigmoid(y) = 0.5 * tanh(y / 2) + 0.5.
    y = 0.5 * jnp.tanh(0.5 * y) + 0.5

    out_ref[...] = y.astype(out_ref.dtype)


def pad_mlp_params(w1, b1, w2, b2):
    """Zero-pad hidden/output dims to lane multiples. Call ONCE at model init."""
    D_in, H2 = w1.shape
    D_out = w2.shape[1]
    H2p = _round_up(H2, _LANE)
    Dop = _round_up(D_out, _LANE)
    w1p = jnp.pad(w1, ((0, 0), (0, H2p - H2)))
    b1p = jnp.pad(jnp.reshape(b1, (1, -1)), ((0, 0), (0, H2p - H2)))
    w2p = jnp.pad(w2, ((0, H2p - H2), (0, Dop - D_out)))
    b2p = jnp.pad(jnp.reshape(b2, (1, -1)), ((0, 0), (0, Dop - D_out)))
    return w1p, b1p, w2p, b2p


def mlp_forward(x, w1p, b1p, w2p, b2p, *, out_features=None, block_b=None):
    """x: (B, D_in); padded params from pad_mlp_params. Returns (B, out_features)."""
    B, D_in = x.shape
    H2p = w1p.shape[1]
    Dop = w2p.shape[1]
    if out_features is None:
        out_features = Dop

    x_item = jnp.dtype(x.dtype).itemsize
    w1_item = jnp.dtype(w1p.dtype).itemsize
    w2_item = jnp.dtype(w2p.dtype).itemsize
    out_item = x_item

    # Bytes per batch row held in VMEM: double-buffered x and out tiles plus the
    # f32 layer-1 intermediate the compiler keeps live.
    bytes_per_row = 2 * D_in * x_item + 2 * Dop * out_item + H2p * 4
    if block_b is None:
        tile_budget = 8 << 20  # ~8 MiB of tiles: safe on v5e's 16 MiB scoped default
        block_b = max(_SUBLANE,
                      min(1024, (tile_budget // bytes_per_row) // _SUBLANE * _SUBLANE))

    # Balanced batch tiling; force >=2 grid steps when the batch is big enough so
    # dimension_semantics=("parallel",) actually shards across v7x's 2 TCs.
    min_steps = 2 if B >= 2 * _SUBLANE else 1
    steps = max(min_steps, _cdiv(B, block_b))
    tb = _round_up(_cdiv(B, steps), _SUBLANE)
    if tb >= 256:  # match 2x256 MXU M-granularity for big tiles (v6e/v7x)
        tb = _round_up(tb, 256)
    Bp = steps * tb

    # Per-call padding: only the activations.
    xp = jnp.pad(x, ((0, Bp - B), (0, 0)))

    # Explicit VMEM budget: single-buffered resident weights + double-buffered
    # x/out tiles + f32 intermediate, with 2x headroom (floor 8 MiB, cap 64 MiB
    # = v7x physical per-TC VMEM).
    resident_bytes = (w1p.size + b1p.size) * w1_item + (w2p.size + b2p.size) * w2_item
    tile_bytes = tb * (2 * D_in * x_item + 2 * Dop * out_item + H2p * 4)
    vmem_limit = int(min(64 << 20, max(8 << 20, 2 * (resident_bytes + tile_bytes) + (2 << 20))))

    cost = pl.CostEstimate(
        flops=2 * Bp * (D_in * H2p + H2p * Dop),
        transcendentals=Bp * Dop,  # one tanh per output element
        bytes_accessed=(xp.size * x_item
                        + (w1p.size + b1p.size) * w1_item
                        + (w2p.size + b2p.size) * w2_item
                        + Bp * Dop * out_item),
    )

    resident = dict(pipeline_mode=pl.Buffered(1))  # constant index_map -> no double buffer
    out = pl.pallas_call(
        _mlp_kernel,
        out_shape=jax.ShapeDtypeStruct((Bp, Dop), x.dtype),
        grid=(steps,),
        in_specs=[
            pl.BlockSpec((tb, D_in), lambda i: (i, 0)),               # x tile per step
            pl.BlockSpec((D_in, H2p), lambda i: (0, 0), **resident),  # weights resident
            pl.BlockSpec((1, H2p), lambda i: (0, 0), **resident),
            pl.BlockSpec((H2p, Dop), lambda i: (0, 0), **resident),
            pl.BlockSpec((1, Dop), lambda i: (0, 0), **resident),
        ],
        out_specs=pl.BlockSpec((tb, Dop), lambda i: (i, 0)),
        compiler_params=pltpu.CompilerParams(
            dimension_semantics=("parallel",),
            vmem_limit_bytes=vmem_limit,
        ),
        cost_estimate=cost,
    )(xp, w1p, b1p, w2p, b2p)

    # Drop padded batch rows / output columns.
    return out[:B, :out_features]


def _reference(x, w1, b1, w2, b2):
    h = jnp.maximum(x @ w1 + b1, 0.0)
    return jax.nn.sigmoid(h @ w2 + b2)


if __name__ == "__main__":
    # Small shapes consistent with the module's forward:
    batch = 8
    input_size = 32
    hidden_size = 32          # first layer has hidden_size * 2 = 64 units
    output_size = 4

    key = jax.random.PRNGKey(0)
    k_x, k_w1, k_b1, k_w2, k_b2 = jax.random.split(key, 5)

    x = jax.random.normal(k_x, (batch, input_size), dtype=jnp.float32)

    # Deterministic parameter init (uniform, roughly PyTorch's kaiming-uniform scale).
    bound1 = 1.0 / jnp.sqrt(input_size)
    w1 = jax.random.uniform(k_w1, (input_size, hidden_size * 2),
                            minval=-bound1, maxval=bound1, dtype=jnp.float32)
    b1 = jax.random.uniform(k_b1, (hidden_size * 2,),
                            minval=-bound1, maxval=bound1, dtype=jnp.float32)

    bound2 = 1.0 / jnp.sqrt(hidden_size * 2)
    w2 = jax.random.uniform(k_w2, (hidden_size * 2, output_size),
                            minval=-bound2, maxval=bound2, dtype=jnp.float32)
    b2 = jax.random.uniform(k_b2, (output_size,),
                            minval=-bound2, maxval=bound2, dtype=jnp.float32)

    # Pad weights ONCE at init (not inside the per-call forward).
    w1p, b1p, w2p, b2p = pad_mlp_params(w1, b1, w2, b2)

    fwd = jax.jit(functools.partial(mlp_forward, out_features=output_size))
    out = jax.block_until_ready(fwd(x, w1p, b1p, w2p, b2p))

    ref = _reference(x, w1, b1, w2, b2)
    assert out.shape == (batch, output_size)
    assert jnp.allclose(out, ref, atol=1e-5, rtol=1e-5), "mismatch vs JAX reference"

    print("KERNEL_OK")
</pallas_src>

<mosaic_0001>
module attributes {stable_mosaic.version = 11 : i64} {
  func.func @_mlp_kernel(%arg0: i32, %arg1: memref<8x32xf32, #tpu.memory_space<vmem>>, %arg2: memref<32x128xf32, #tpu.memory_space<vmem>>, %arg3: memref<1x128xf32, #tpu.memory_space<vmem>>, %arg4: memref<128x128xf32, #tpu.memory_space<vmem>>, %arg5: memref<1x128xf32, #tpu.memory_space<vmem>>, %arg6: memref<8x128xf32, #tpu.memory_space<vmem>>) attributes {dimension_semantics = [#tpu.dimension_semantics<parallel>], iteration_bounds = array<i64: 1>, scalar_prefetch = 0 : i64, scratch_operands = 0 : i64, tpu.core_type = #tpu.core_type<tc>, window_params = [{transform_indices = @transform_0, window_bounds = array<i64: 8, 32>}, {pipeline_mode = #tpu.pipeline_mode<synchronous>, transform_indices = @transform_1, window_bounds = array<i64: 32, 128>}, {pipeline_mode = #tpu.pipeline_mode<synchronous>, transform_indices = @transform_2, window_bounds = array<i64: 1, 128>}, {pipeline_mode = #tpu.pipeline_mode<synchronous>, transform_indices = @transform_3, window_bounds = array<i64: 128, 128>}, {pipeline_mode = #tpu.pipeline_mode<synchronous>, transform_indices = @transform_4, window_bounds = array<i64: 1, 128>}, {transform_indices = @transform_5, window_bounds = array<i64: 8, 128>}]} {
    %c0 = arith.constant 0 : index
    %c0_0 = arith.constant 0 : index
    %0 = vector.load %arg1[%c0, %c0_0] : memref<8x32xf32, #tpu.memory_space<vmem>>, vector<8x32xf32>
    %c0_1 = arith.constant 0 : index
    %c0_2 = arith.constant 0 : index
    %1 = vector.load %arg2[%c0_1, %c0_2] : memref<32x128xf32, #tpu.memory_space<vmem>>, vector<32x128xf32>
    %cst = arith.constant dense<0.000000e+00> : vector<8x128xf32>
    %2 = tpu.matmul %0, %1, %cst {dimension_numbers = #tpu.dot_dimension_numbers<[1], [0], [0], [1], [0, 0, 1, 1], [], []>} : vector<8x32xf32>, vector<32x128xf32>, vector<8x128xf32> -> vector<8x128xf32>
    %c0_3 = arith.constant 0 : index
    %c0_4 = arith.constant 0 : index
    %3 = vector.load %arg3[%c0_3, %c0_4] : memref<1x128xf32, #tpu.memory_space<vmem>>, vector<1x128xf32>
    %4 = vector.broadcast %3 : vector<1x128xf32> to vector<8x128xf32>
    %5 = arith.addf %2, %4 : vector<8x128xf32>
    %cst_5 = arith.constant 0.000000e+00 : f32
    %6 = vector.broadcast %cst_5 : f32 to vector<8x128xf32>
    %7 = arith.maximumf %5, %6 : vector<8x128xf32>
    %c0_6 = arith.constant 0 : index
    %c0_7 = arith.constant 0 : index
    %8 = vector.load %arg4[%c0_6, %c0_7] : memref<128x128xf32, #tpu.memory_space<vmem>>, vector<128x128xf32>
    %cst_8 = arith.constant dense<0.000000e+00> : vector<8x128xf32>
    %9 = tpu.matmul %7, %8, %cst_8 {dimension_numbers = #tpu.dot_dimension_numbers<[1], [0], [0], [1], [0, 0, 1, 1], [], []>} : vector<8x128xf32>, vector<128x128xf32>, vector<8x128xf32> -> vector<8x128xf32>
    %c0_9 = arith.constant 0 : index
    %c0_10 = arith.constant 0 : index
    %10 = vector.load %arg5[%c0_9, %c0_10] : memref<1x128xf32, #tpu.memory_space<vmem>>, vector<1x128xf32>
    %11 = vector.broadcast %10 : vector<1x128xf32> to vector<8x128xf32>
    %12 = arith.addf %9, %11 : vector<8x128xf32>
    %cst_11 = arith.constant 5.000000e-01 : f32
    %13 = vector.broadcast %cst_11 : f32 to vector<8x128xf32>
    %14 = arith.mulf %13, %12 : vector<8x128xf32>
    %15 = math.tanh %14 : vector<8x128xf32>
    %cst_12 = arith.constant 5.000000e-01 : f32
    %16 = vector.broadcast %cst_12 : f32 to vector<8x128xf32>
    %17 = arith.mulf %16, %15 : vector<8x128xf32>
    %cst_13 = arith.constant 5.000000e-01 : f32
    %18 = vector.broadcast %cst_13 : f32 to vector<8x128xf32>
    %19 = arith.addf %17, %18 : vector<8x128xf32>
    %c0_14 = arith.constant 0 : index
    %c0_15 = arith.constant 0 : index
    %20 = vector.load %arg6[%c0_14, %c0_15] : memref<8x128xf32, #tpu.memory_space<vmem>>, vector<8x128xf32>
    tpu.vector_store %arg6[%c0_14, %c0_15], %19 {strides = array<i32>} : memref<8x128xf32, #tpu.memory_space<vmem>>, vector<8x128xf32>,
    return
  }
  func.func @transform_0(%arg0: i32) -> (i32, i32) {
    %c0_i32 = arith.constant 0 : i32
    %c0_i32_0 = arith.constant 0 : i32
    return %arg0, %c0_i32 : i32, i32
  }
  func.func @transform_1(%arg0: i32) -> (i32, i32) {
    %c0_i32 = arith.constant 0 : i32
    %c0_i32_0 = arith.constant 0 : i32
    %c0_i32_1 = arith.constant 0 : i32
    return %c0_i32, %c0_i32_0 : i32, i32
  }
  func.func @transform_2(%arg0: i32) -> (i32, i32) {
    %c0_i32 = arith.constant 0 : i32
    %c0_i32_0 = arith.constant 0 : i32
    %c0_i32_1 = arith.constant 0 : i32
    return %c0_i32, %c0_i32_0 : i32, i32
  }
  func.func @transform_3(%arg0: i32) -> (i32, i32) {
    %c0_i32 = arith.constant 0 : i32
    %c0_i32_0 = arith.constant 0 : i32
    %c0_i32_1 = arith.constant 0 : i32
    return %c0_i32, %c0_i32_0 : i32, i32
  }
  func.func @transform_4(%arg0: i32) -> (i32, i32) {
    %c0_i32 = arith.constant 0 : i32
    %c0_i32_0 = arith.constant 0 : i32
    %c0_i32_1 = arith.constant 0 : i32
    return %c0_i32, %c0_i32_0 : i32, i32
  }
  func.func @transform_5(%arg0: i32) -> (i32, i32) {
    %c0_i32 = arith.constant 0 : i32
    %c0_i32_0 = arith.constant 0 : i32
    return %arg0, %c0_i32 : i32, i32
  }
}

</mosaic_0001>

<bundles_post_ra>
// kernel: mlp_forward.1
= control target key start
LH: loop header
LB: loop body
LE: loop exit
PB: predicated region body
PF: predicated region fallthrough
CT: control target
= control target key end

     0   :  { %10 = vsyncpa [#allocation3], 0  ;;  %s471_s0 = inlined_call_operand.hbm [shape: f32[8,32], index: 0, kind: input, shape index: {}]   ;;  %s472_s1 = inlined_call_operand.hbm [shape: f32[32,128], index: 1, kind: input, shape index: {}]   ;;  %s473_s2 = inlined_call_operand.vmem [shape: f32[1,128], index: 2, kind: input, shape index: {}]   ;;  %s474_s3 = inlined_call_operand.hbm [shape: f32[128,128], index: 3, kind: input, shape index: {}]   ;;  %s475_s4 = inlined_call_operand.vmem [shape: f32[1,128], index: 4, kind: input, shape index: {}]   ;;  %s476_s5 = inlined_call_operand.vmem [shape: f32[8,128], index: 5, kind: output, shape index: {}]  }
   0x1   :  { %11 = vsyncpa [#allocation5], 0  ;;  %s394_s18 = smov [#allocation4]  }
   0x2   :  { %s27_s19 = sshll.u32 %s394_s18, 4  ;;  %s28_s19 = int_to_ptr.vmem [resolvable:$true] %s27_s19 }
   0x3   :  { %s338_s20 = scalar_lea.vmem %s28_s19, 512  ;;  %p343_p1 = scmp.lt.s32.totalorder %s28_s19, %s28_s19 }
   0x4   :  { %p339_p0 = scmp.ne.s32.totalorder %s28_s19, %s338_s20  ;;  %p344_p2 = scmp.lt.s32.totalorder %s338_s20, %s338_s20 }
   0x6   :  { %p345_p3 = por %p344_p2, %p343_p1 }
   0x8   :  { %p346_p4 = pnand %p345_p3, %p339_p0 }
   0xa   :  { %349 = shalt.err (!%p346_p4)
}
   0xb   :  { %s395_s21 = smov 128   ;;  %s396_s22 = smov 8  }
   0xc   :  { %33 = dma.hbm_to_vmem [thread:$0]  %s472_s1, 512, %s28_s19, [#allocation5], %s395_s21, %s395_s21, %s396_s22  }
   0xd   :  { %s397_s25 = smov [#allocation2]   ;;  %s398_s27 = smov [#allocation6]  }
   0xe   :  { %s18_s26 = sshll.u32 %s397_s25, 4  ;;  %s41_s28 = sshll.u32 %s398_s27, 4  ;;  %s19_s26 = int_to_ptr.vmem [resolvable:$true] %s18_s26  ;;  %s42_s28 = int_to_ptr.vmem [resolvable:$true] %s41_s28 }
   0xf   :  { %s358_s29 = scalar_lea.vmem %s19_s26, 128  ;;  %p363_p6 = scmp.lt.s32.totalorder %s19_s26, %s19_s26 }
  0x10   :  { %p359_p5 = scmp.ne.s32.totalorder %s19_s26, %s358_s29  ;;  %p364_p7 = scmp.lt.s32.totalorder %s358_s29, %s358_s29 }
  0x12   :  { %p365_p8 = por %p364_p7, %p363_p6 }
  0x14   :  { %p366_p9 = pnand %p365_p8, %p359_p5 }
  0x16   :  { %369 = shalt.err (!%p366_p9)
}
  0x17   :  { %21 = dma.hbm_to_vmem [thread:$0]  %s471_s0, 128, %s19_s26, [#allocation3]  }
  0x18   :  { %s378_s7 = scalar_lea.vmem %s42_s28, 2048  ;;  %p383_p11 = scmp.lt.s32.totalorder %s42_s28, %s42_s28 }
  0x19   :  { %p379_p10 = scmp.ne.s32.totalorder %s42_s28, %s378_s7  ;;  %p384_p12 = scmp.lt.s32.totalorder %s378_s7, %s378_s7 }
  0x1b   :  { %p385_p13 = por %p384_p12, %p383_p11 }
  0x1d   :  { %p386_p0 = pnand %p385_p13, %p379_p10 }
  0x1f   :  { %389 = shalt.err (!%p386_p0)
}
  0x20   :  { %47 = dma.hbm_to_vmem [thread:$0]  %s474_s3, 2048, %s42_s28, [#allocation5], %s395_s21, %s395_s21, %s396_s22  }
  0x21   :  { %390 = dma.done.wait [#allocation3], 128  }
  0x22   :  { %391 = vsyncadd [#allocation3], 4294967168 }
  0x23   :  { %392 = dma.done.wait [#allocation5], 2560  }
  0x24   :  { %393 = vsyncadd [#allocation5], 4294964736  ;;  %v399_v0 = vmov 0.0   ;;  %vm400_vm0 = vmmov 0   ;;  %v63_v1 = vld [vmem:[#allocation4 + $0x18] sm:$0xff]  ;;  %v62_v2 = vld [vmem:[#allocation4 + $0x10] sm:$0xff] }
  0x25   :  { %275 = vmatprep.subr.mxu0 %v399_v0  ;;  %283 = vmatprep.mubr.msk.f32.mxu0 %vm400_vm0, %v399_v0  ;;  %v161_v3 = vld [vmem:[#allocation6 + $0x78] sm:$0xff]  ;;  %v61_v4 = vld [vmem:[#allocation4 + $0x8] sm:$0xff]  ;;  %v160_v5 = vld [vmem:[#allocation6 + $0x70] sm:$0xff]  ;;  %vm71_vm1 = vcmask 261120  }
  0x26   :  { %286 = vmatprep.subr.mxu1 %v399_v0  ;;  %318 = vmatprep.mubr.msk.f32.mxu1 %vm400_vm0, %v399_v0  ;;  %v159_v6 = vld [vmem:[#allocation6 + $0x68] sm:$0xff]  ;;  %v60_v7 = vld [vmem:[#allocation4] sm:$0xff]  ;;  %v59_v8 = vld [vmem:[#allocation2] sm:$0xff] }
  0x27   :  { %276 = vmatpush3.msra.mxu0 %v63_v1  ;;  %287 = vmatpush3.msra.mxu1 %v161_v3  ;;  %v158_v9 = vld [vmem:[#allocation6 + $0x60] sm:$0xff]  ;;  %v157_v10 = vld [vmem:[#allocation6 + $0x58] sm:$0xff]  ;;  %v156_v11 = vld [vmem:[#allocation6 + $0x50] sm:$0xff] }
  0x28   :  { %277 = vmatprep.subr.mxu0 %v399_v0  ;;  %288 = vmatprep.subr.mxu1 %v399_v0  ;;  %v155_v12 = vld [vmem:[#allocation6 + $0x48] sm:$0xff]  ;;  %v154_v13 = vld [vmem:[#allocation6 + $0x40] sm:$0xff]  ;;  %v153_v14 = vld [vmem:[#allocation6 + $0x38] sm:$0xff] }
  0x29   :  { %278 = vmatpush3.msra.mxu0 %v62_v2  ;;  %289 = vmatpush3.msra.mxu1 %v160_v5  ;;  %v152_v15 = vld [vmem:[#allocation6 + $0x30] sm:$0xff]  ;;  %v151_v16 = vld [vmem:[#allocation6 + $0x28] sm:$0xff]  ;;  %v150_v17 = vld [vmem:[#allocation6 + $0x20] sm:$0xff] }
  0x2a   :  { %279 = vmatprep.subr.mxu0 %v399_v0  ;;  %290 = vmatprep.subr.mxu1 %v399_v0  ;;  %v149_v18 = vld [vmem:[#allocation6 + $0x18] sm:$0xff]  ;;  %v148_v19 = vld [vmem:[#allocation6 + $0x10] sm:$0xff]  ;;  %v147_v20 = vld [vmem:[#allocation6 + $0x8] sm:$0xff] }
  0x2b   :  { %280 = vmatpush3.msra.mxu0 %v61_v4  ;;  %291 = vmatpush3.msra.mxu1 %v159_v6  ;;  %v146_v21 = vld [vmem:[#allocation6] sm:$0xff]  ;;  %v250_v22 = vld [vmem:[%s473_s2] ss:$0 sm:$0xff] }
  0x2c   :  { %281 = vmatprep.subr.mxu0 %v399_v0  ;;  %292 = vmatprep.subr.mxu1 %v399_v0  ;;  %v252_v27 = vld [vmem:[%s475_s4] ss:$0 sm:$0xff] }
  0x2d   :  { %282 = vmatpush3.msra.mxu0 %v60_v7  ;;  %293 = vmatpush3.msra.mxu1 %v158_v9 }
  0x2e   :  { %284 = vmatmul.mubr.msk.f32.vlgmr.msra.gmra.mxu0 %vm71_vm1, %v59_v8  ;;  %294 = vmatprep.subr.mxu1 %v399_v0 }
  0x2f   :  { %295 = vmatpush3.msra.mxu1 %v157_v10 }
  0x30   :  { %296 = vmatprep.subr.mxu1 %v399_v0 }
  0x31   :  { %297 = vmatpush3.msra.mxu1 %v156_v11 }
  0x32   :  { %298 = vmatprep.subr.mxu1 %v399_v0 }
  0x33   :  { %299 = vmatpush3.msra.mxu1 %v155_v12 }
  0x34   :  { %300 = vmatprep.subr.mxu1 %v399_v0 }
  0x35   :  { %301 = vmatpush3.msra.mxu1 %v154_v13 }
  0x36   :  { %302 = vmatprep.subr.mxu1 %v399_v0 }
  0x37   :  { %303 = vmatpush3.msra.mxu1 %v153_v14 }
  0x38   :  { %304 = vmatprep.subr.mxu1 %v399_v0 }
  0x39   :  { %305 = vmatpush3.msra.mxu1 %v152_v15 }
  0x3a   :  { %306 = vmatprep.subr.mxu1 %v399_v0 }
  0x3b   :  { %307 = vmatpush3.msra.mxu1 %v151_v16 }
  0x3c   :  { %308 = vmatprep.subr.mxu1 %v399_v0 }
  0x3d   :  { %309 = vmatpush3.msra.mxu1 %v150_v17 }
  0x3e   :  { %310 = vmatprep.subr.mxu1 %v399_v0 }
  0x3f   :  { %311 = vmatpush3.msra.mxu1 %v149_v18 }
  0x40   :  { %312 = vmatprep.subr.mxu1 %v399_v0 }
  0x41   :  { %313 = vmatpush3.msra.mxu1 %v148_v19 }
  0x42   :  { %314 = vmatprep.subr.mxu1 %v399_v0 }
  0x43   :  { %315 = vmatpush3.msra.mxu1 %v147_v20 }
  0x44   :  { %316 = vmatprep.subr.mxu1 %v399_v0 }
  0x45   :  { %317 = vmatpush3.msra.mxu1 %v146_v21 }
  0xee   :  { %v141_v23 = vpop.f32.mrf.mxu0 }
  0xef   :  { %v142_v24 = vadd.f32 %v250_v22, %v141_v23 }
  0xf0   :  { %v285_v25 = vpop.f32.mrf.mxu0 }
  0xf1   :  { %v145_v26 = vmax.f32 %v142_v24, 0.0 }
  0xf3   :  { %319 = vmatmul.mubr.f32.vlgmr.msra.gmra.mxu1 %v145_v26 }
 0x1b3   :  { %v235_v28 = vpop.f32.mrf.mxu1 }
 0x1b4   :  { %v236_v29 = vadd.f32 %v252_v27, %v235_v28 }
 0x1b5   :  { %v320_v30 = vpop.f32.mrf.mxu1 }
 0x1b6   :  { %v239_v31 = vmul.f32 0.5, %v236_v29 }
 0x1b8   :  { %328 = vtanh.f32 %v239_v31 }
 0x1c5   :  { %v329_v32 = vpop.eup %328 }
 0x1c6   :  { %v241_v33 = vmul.f32 0.5, %v329_v32 }
 0x1c8   :  { %v242_v34 = vadd.f32 0.5, %v241_v33 }
 0x1ca   :  { %243 = vst [vmem:[%s476_s5] sm:$0xff] %v242_v34 }
 0x1cb   :  { %248 = vsyncpa [#allocation3], 1 }
 0x1cc   :  { %249 = vsyncpa [#allocation5], 1 }

</bundles_post_ra>
